<compile_context>
chip_gen: v5e
topology: v5e:2x2
jax: 0.10.0
libtpu: 0.0.40
codegen_flags: <defaults>
</compile_context>

<pallas_src>
import jax
import jax.numpy as jnp
from jax.experimental import pallas as pl
from jax.experimental.pallas import tpu as pltpu

IN_FEATURES = 256
HIDDEN = 64
NOUT = 10
NPAD = 128  # lane-dense output width


def _round_up(x, m):
    return (x + m - 1) // m * m


def _mlp_softmax_kernel(x_ref, w1_ref, b1_ref, w2_ref, b2_ref, o_ref):
    # Cast x to bf16 on the VPU (plenty of slack in a mem-bound kernel) so the
    # HBM read stays f32 and no wrapper-side cast pass is needed.
    x_bf = x_ref[...].astype(jnp.bfloat16)

    # fc: [TB, 256]bf16 @ [256, 64]bf16 -> f32 accumulation on the MXU.
    h = jnp.dot(x_bf, w1_ref[...], preferred_element_type=jnp.float32)
    h = jnp.maximum(h + b1_ref[...], 0.0)  # bias + relu in f32

    # fc2: [TB, 64]bf16 @ [64, 128]bf16 -> f32 (lane-dense padded output).
    logits = jnp.dot(h.astype(jnp.bfloat16), w2_ref[...],
                     preferred_element_type=jnp.float32)
    # Padded lanes carry a -1e30 f32 bias -> exp underflows to exactly 0.
    logits = logits + b2_ref[...]

    # Numerically stable softmax over the (padded) last dim.
    m = jnp.max(logits, axis=-1, keepdims=True)
    e = jnp.exp(logits - m)
    denom = jnp.sum(e, axis=-1, keepdims=True)
    # Exact divide (not approx reciprocal) so row sums are exactly 1 in f32.
    o_ref[...] = (e / denom).astype(o_ref.dtype)


def prepare_params(w1, b1, w2, b2):
    """One-time weight prep (call at model-load time, not per forward)."""
    assert w1.shape == (IN_FEATURES, HIDDEN) and w2.shape == (HIDDEN, NOUT)
    w2_p = jnp.zeros((HIDDEN, NPAD), jnp.float32).at[:, :NOUT].set(w2)
    # Padded-lane bias must stay f32 -1e30 (do NOT cast to bf16).
    b2_p = jnp.full((1, NPAD), -1e30, jnp.float32).at[0, :NOUT].set(b2)
    return (w1.astype(jnp.bfloat16),
            b1.reshape(1, HIDDEN).astype(jnp.float32),
            w2_p.astype(jnp.bfloat16),
            b2_p)


def simple_model_forward(x, prepped_params, *, block_b=1024,
                         out_dtype=jnp.bfloat16):
    """x: [B, 256] f32; prepped_params from prepare_params()."""
    w1b, b1_2d, w2b, b2_p = prepped_params
    B, F = x.shape
    assert F == IN_FEATURES

    # Batch tile: multiple of 8 (f32 sublane).  For large batches keep >= 4
    # grid steps so the "parallel" axis load-balances across v7x's 2 TCs.
    TB = min(block_b, _round_up(B, 8))
    if B >= 4 * 512:
        TB = min(TB, max(512, _round_up(pl.cdiv(B, 4), 8)))
    grid = (pl.cdiv(B, TB),)  # ragged last block handled by Pallas (no jnp.pad)

    # VMEM budget: double-buffered x/out tiles + resident weights + in-kernel
    # intermediates (bf16 x copy, h f32+bf16, logits, e) + 25% headroom.
    out_bytes = jnp.dtype(out_dtype).itemsize
    x_tile = TB * F * 4
    out_tile = TB * NPAD * out_bytes
    weight_bytes = F * HIDDEN * 2 + HIDDEN * NPAD * 2 + (HIDDEN + NPAD) * 4
    interm = TB * (F * 2 + HIDDEN * 6 + 2 * NPAD * 4)
    vmem_need = 2 * (x_tile + out_tile + weight_bytes) + interm
    vmem_limit = min(48 * 1024 * 1024,
                     max(4 * 1024 * 1024, int(vmem_need * 1.25)))

    out = pl.pallas_call(
        _mlp_softmax_kernel,
        out_shape=jax.ShapeDtypeStruct((B, NPAD), out_dtype),
        grid=grid,
        in_specs=[
            pl.BlockSpec((TB, F), lambda i: (i, 0)),         # x (f32): batch-tiled
            pl.BlockSpec((F, HIDDEN), lambda i: (0, 0)),     # w1 bf16: resident
            pl.BlockSpec((1, HIDDEN), lambda i: (0, 0)),     # b1 f32: resident
            pl.BlockSpec((HIDDEN, NPAD), lambda i: (0, 0)),  # w2 bf16 padded: resident
            pl.BlockSpec((1, NPAD), lambda i: (0, 0)),       # b2 f32 padded: resident
        ],
        out_specs=pl.BlockSpec((TB, NPAD), lambda i: (i, 0)),
        compiler_params=pltpu.CompilerParams(
            dimension_semantics=("parallel",),
            vmem_limit_bytes=int(vmem_limit),
        ),
    )(x, w1b, b1_2d, w2b, b2_p)

    # Slice to the 10 real classes (module contract).  For a fused consumer,
    # return the padded slab instead to avoid this extra pass.
    return out[:, :NOUT]


def _init_params(key):
    """Deterministic synthetic params matching nn.Linear(256,64), nn.Linear(64,10)."""
    k1, k2, k3, k4 = jax.random.split(key, 4)
    lim1 = 1.0 / jnp.sqrt(256.0)
    lim2 = 1.0 / jnp.sqrt(64.0)
    w1 = jax.random.uniform(k1, (IN_FEATURES, HIDDEN), jnp.float32, -lim1, lim1)
    b1 = jax.random.uniform(k2, (HIDDEN,), jnp.float32, -lim1, lim1)
    w2 = jax.random.uniform(k3, (HIDDEN, NOUT), jnp.float32, -lim2, lim2)
    b2 = jax.random.uniform(k4, (NOUT,), jnp.float32, -lim2, lim2)
    return w1, b1, w2, b2


if __name__ == "__main__":
    key = jax.random.PRNGKey(0)
    kx, kp = jax.random.split(key)
    batch = 8
    x = jax.random.normal(kx, (batch, IN_FEATURES), jnp.float32)
    w1, b1, w2, b2 = _init_params(kp)

    prepped = prepare_params(w1, b1, w2, b2)  # one-time, outside the hot loop
    out = simple_model_forward(x, prepped)
    out = jax.block_until_ready(out)

    # Reference in plain JAX f32 (bf16 MXU inputs / bf16 output -> relaxed tol).
    h_ref = jnp.maximum(x @ w1 + b1, 0.0)
    ref = jax.nn.softmax(h_ref @ w2 + b2, axis=-1)

    out_f32 = out.astype(jnp.float32)
    assert out.shape == (batch, NOUT)
    assert jnp.allclose(out_f32, ref, atol=2e-2, rtol=2e-2), \
        float(jnp.max(jnp.abs(out_f32 - ref)))
    # Exact in-kernel normalization; only bf16 output rounding remains.
    assert jnp.allclose(jnp.sum(out_f32, axis=-1), 1.0, atol=1e-2), \
        float(jnp.max(jnp.abs(jnp.sum(out_f32, axis=-1) - 1.0)))

    print("KERNEL_OK")
</pallas_src>

<mosaic_0001>
module attributes {stable_mosaic.version = 11 : i64} {
  func.func @_mlp_softmax_kernel(%arg0: i32, %arg1: memref<8x256xf32, #tpu.memory_space<vmem>>, %arg2: memref<256x64xbf16, #tpu.memory_space<vmem>>, %arg3: memref<1x64xf32, #tpu.memory_space<vmem>>, %arg4: memref<64x128xbf16, #tpu.memory_space<vmem>>, %arg5: memref<1x128xf32, #tpu.memory_space<vmem>>, %arg6: memref<8x128xbf16, #tpu.memory_space<vmem>>) attributes {dimension_semantics = [#tpu.dimension_semantics<parallel>], iteration_bounds = array<i64: 1>, scalar_prefetch = 0 : i64, scratch_operands = 0 : i64, tpu.core_type = #tpu.core_type<tc>, window_params = [{transform_indices = @transform_0, window_bounds = array<i64: 8, 256>}, {pipeline_mode = #tpu.pipeline_mode<synchronous>, transform_indices = @transform_1, window_bounds = array<i64: 256, 64>}, {pipeline_mode = #tpu.pipeline_mode<synchronous>, transform_indices = @transform_2, window_bounds = array<i64: 1, 64>}, {pipeline_mode = #tpu.pipeline_mode<synchronous>, transform_indices = @transform_3, window_bounds = array<i64: 64, 128>}, {pipeline_mode = #tpu.pipeline_mode<synchronous>, transform_indices = @transform_4, window_bounds = array<i64: 1, 128>}, {transform_indices = @transform_5, window_bounds = array<i64: 8, 128>}]} {
    %c0 = arith.constant 0 : index
    %c0_0 = arith.constant 0 : index
    %0 = vector.load %arg1[%c0, %c0_0] : memref<8x256xf32, #tpu.memory_space<vmem>>, vector<8x256xf32>
    %1 = arith.truncf %0 : vector<8x256xf32> to vector<8x256xbf16>
    %c0_1 = arith.constant 0 : index
    %c0_2 = arith.constant 0 : index
    %2 = vector.load %arg2[%c0_1, %c0_2] : memref<256x64xbf16, #tpu.memory_space<vmem>>, vector<256x64xbf16>
    %cst = arith.constant dense<0.000000e+00> : vector<8x64xf32>
    %3 = tpu.matmul %1, %2, %cst {dimension_numbers = #tpu.dot_dimension_numbers<[1], [0], [0], [1], [0, 0, 1, 1], [], []>} : vector<8x256xbf16>, vector<256x64xbf16>, vector<8x64xf32> -> vector<8x64xf32>
    %c0_3 = arith.constant 0 : index
    %c0_4 = arith.constant 0 : index
    %4 = vector.load %arg3[%c0_3, %c0_4] : memref<1x64xf32, #tpu.memory_space<vmem>>, vector<1x64xf32>
    %5 = vector.broadcast %4 : vector<1x64xf32> to vector<8x64xf32>
    %6 = arith.addf %3, %5 : vector<8x64xf32>
    %cst_5 = arith.constant 0.000000e+00 : f32
    %7 = vector.broadcast %cst_5 : f32 to vector<8x64xf32>
    %8 = arith.maximumf %6, %7 : vector<8x64xf32>
    %9 = arith.truncf %8 : vector<8x64xf32> to vector<8x64xbf16>
    %c0_6 = arith.constant 0 : index
    %c0_7 = arith.constant 0 : index
    %10 = vector.load %arg4[%c0_6, %c0_7] : memref<64x128xbf16, #tpu.memory_space<vmem>>, vector<64x128xbf16>
    %cst_8 = arith.constant dense<0.000000e+00> : vector<8x128xf32>
    %11 = tpu.matmul %9, %10, %cst_8 {dimension_numbers = #tpu.dot_dimension_numbers<[1], [0], [0], [1], [0, 0, 1, 1], [], []>} : vector<8x64xbf16>, vector<64x128xbf16>, vector<8x128xf32> -> vector<8x128xf32>
    %c0_9 = arith.constant 0 : index
    %c0_10 = arith.constant 0 : index
    %12 = vector.load %arg5[%c0_9, %c0_10] : memref<1x128xf32, #tpu.memory_space<vmem>>, vector<1x128xf32>
    %13 = vector.broadcast %12 : vector<1x128xf32> to vector<8x128xf32>
    %14 = arith.addf %11, %13 : vector<8x128xf32>
    %cst_11 = arith.constant dense<0xFF800000> : vector<8xf32>
    %15 = vector.multi_reduction <maximumf>, %14, %cst_11 [1] : vector<8x128xf32> to vector<8xf32>
    %16 = vector.shape_cast %15 : vector<8xf32> to vector<8x1xf32>
    %17 = vector.broadcast %16 : vector<8x1xf32> to vector<8x128xf32>
    %18 = arith.subf %14, %17 : vector<8x128xf32>
    %19 = math.exp %18 : vector<8x128xf32>
    %cst_12 = arith.constant dense<0.000000e+00> : vector<8xf32>
    %20 = vector.multi_reduction <add>, %19, %cst_12 [1] : vector<8x128xf32> to vector<8xf32>
    %21 = vector.shape_cast %20 : vector<8xf32> to vector<8x1xf32>
    %22 = vector.broadcast %21 : vector<8x1xf32> to vector<8x128xf32>
    %23 = arith.divf %19, %22 : vector<8x128xf32>
    %24 = arith.truncf %23 : vector<8x128xf32> to vector<8x128xbf16>
    %c0_13 = arith.constant 0 : index
    %c0_14 = arith.constant 0 : index
    %25 = vector.load %arg6[%c0_13, %c0_14] : memref<8x128xbf16, #tpu.memory_space<vmem>>, vector<8x128xbf16>
    tpu.vector_store %arg6[%c0_13, %c0_14], %24 {strides = array<i32>} : memref<8x128xbf16, #tpu.memory_space<vmem>>, vector<8x128xbf16>,
    return
  }
  func.func @transform_0(%arg0: i32) -> (i32, i32) {
    %c0_i32 = arith.constant 0 : i32
    %c0_i32_0 = arith.constant 0 : i32
    return %arg0, %c0_i32 : i32, i32
  }
  func.func @transform_1(%arg0: i32) -> (i32, i32) {
    %c0_i32 = arith.constant 0 : i32
    %c0_i32_0 = arith.constant 0 : i32
    %c0_i32_1 = arith.constant 0 : i32
    return %c0_i32, %c0_i32_0 : i32, i32
  }
  func.func @transform_2(%arg0: i32) -> (i32, i32) {
    %c0_i32 = arith.constant 0 : i32
    %c0_i32_0 = arith.constant 0 : i32
    %c0_i32_1 = arith.constant 0 : i32
    return %c0_i32, %c0_i32_0 : i32, i32
  }
  func.func @transform_3(%arg0: i32) -> (i32, i32) {
    %c0_i32 = arith.constant 0 : i32
    %c0_i32_0 = arith.constant 0 : i32
    %c0_i32_1 = arith.constant 0 : i32
    return %c0_i32, %c0_i32_0 : i32, i32
  }
  func.func @transform_4(%arg0: i32) -> (i32, i32) {
    %c0_i32 = arith.constant 0 : i32
    %c0_i32_0 = arith.constant 0 : i32
    %c0_i32_1 = arith.constant 0 : i32
    return %c0_i32, %c0_i32_0 : i32, i32
  }
  func.func @transform_5(%arg0: i32) -> (i32, i32) {
    %c0_i32 = arith.constant 0 : i32
    %c0_i32_0 = arith.constant 0 : i32
    return %arg0, %c0_i32 : i32, i32
  }
}

</mosaic_0001>

<bundles_post_ra>
// kernel: tpu_custom_call.1
= control target key start
LH: loop header
LB: loop body
LE: loop exit
PB: predicated region body
PF: predicated region fallthrough
CT: control target
= control target key end

     0   :  { %s519_s0 = inlined_call_operand.vmem [shape: f32[8,256], index: 0, kind: input, shape index: {}]   ;;  %s520_s1 = inlined_call_operand.vmem [shape: bf16[256,64], index: 1, kind: input, shape index: {}]   ;;  %s521_s2 = inlined_call_operand.vmem [shape: f32[1,64], index: 2, kind: input, shape index: {}]   ;;  %s522_s3 = inlined_call_operand.vmem [shape: bf16[64,128], index: 3, kind: input, shape index: {}]   ;;  %s523_s4 = inlined_call_operand.vmem [shape: f32[1,128], index: 4, kind: input, shape index: {}]   ;;  %s524_s5 = inlined_call_operand.hbm [shape: bf16[8,128], index: 5, kind: output, shape index: {}]  }
   0x1   :  { %v367_v0 = vld [vmem:[%s520_s1 + $0x38] sm:$0xff]  ;;  %v366_v2 = vld [vmem:[%s520_s1 + $0x30] sm:$0xff]  ;;  %v365_v4 = vld [vmem:[%s520_s1 + $0x28] sm:$0xff] }
   0x2   :  { %v375_v1 = vld [vmem:[%s520_s1 + $0x78] sm:$0xff]  ;;  %158 = vmatpush.bf16.msra.mxu0 %v367_v0  ;;  %v374_v3 = vld [vmem:[%s520_s1 + $0x70] sm:$0xff]  ;;  %v373_v5 = vld [vmem:[%s520_s1 + $0x68] sm:$0xff] }
   0x3   :  { %171 = vmatpush.bf16.msra.mxu1 %v375_v1  ;;  %v379_v6 = vld [vmem:[%s522_s3 + $0x18] sm:$0xff] }
   0x6   :  { %159 = vmatpush.bf16.msra.mxu0 %v366_v2 }
   0x7   :  { %172 = vmatpush.bf16.msra.mxu1 %v374_v3 }
   0x8   :  { %10 = vsyncpa [#allocation3], 0  ;;  %230 = vmatpush.bf16.msra.mxu2 %v379_v6  ;;  %v378_v7 = vld [vmem:[%s522_s3 + $0x10] sm:$0xff]  ;;  %v364_v8 = vld [vmem:[%s520_s1 + $0x20] sm:$0xff]  ;;  %vm222_vm0 = vcmask 523264   ;;  %s270_s15 = sshll.u32 %s524_s5, 4  ;;  %s271_s15 = int_to_ptr.hbm [resolvable:$true] %s270_s15 }
   0x9   :  { %v372_v9 = vld [vmem:[%s520_s1 + $0x60] sm:$0xff]  ;;  %v363_v10 = vld [vmem:[%s520_s1 + $0x18] sm:$0xff]  ;;  %v362_v12 = vld [vmem:[%s520_s1 + $0x10] sm:$0xff] }
   0xa   :  { %160 = vmatpush.bf16.msra.mxu0 %v365_v4  ;;  %v371_v11 = vld [vmem:[%s520_s1 + $0x58] sm:$0xff]  ;;  %v370_v13 = vld [vmem:[%s520_s1 + $0x50] sm:$0xff]  ;;  %v361_v14 = vld [vmem:[%s520_s1 + $0x8] sm:$0xff] }
   0xb   :  { %173 = vmatpush.bf16.msra.mxu1 %v373_v5  ;;  %v369_v15 = vld [vmem:[%s520_s1 + $0x48] sm:$0xff]  ;;  %v360_v16 = vld [vmem:[%s520_s1] sm:$0xff] }
   0xc   :  { %231 = vmatpush.bf16.msra.mxu2 %v378_v7  ;;  %v368_v17 = vld [vmem:[%s520_s1 + $0x40] sm:$0xff]  ;;  %v23_v19 = vld [vmem:[%s519_s0 + $0x8] sm:$0xff] }
   0xd   :  { %v22_v18 = vld [vmem:[%s519_s0] sm:$0xff]  ;;  %v25_v21 = vpack.c.bf16 %v23_v19, %v23_v19  ;;  %v377_v22 = vld [vmem:[%s522_s3 + $0x8] sm:$0xff] }
   0xe   :  { %161 = vmatpush.bf16.msra.mxu0 %v364_v8  ;;  %v24_v20 = vpack.c.bf16 %v22_v18, %v22_v18  ;;  %v376_v23 = vld [vmem:[%s522_s3] sm:$0xff] }
   0xf   :  { %174 = vmatpush.bf16.msra.mxu1 %v372_v9  ;;  %v381_v24 = vld [vmem:[%s521_s2] ss:$0 sm:$0xff]  ;;  %s413_s2 = smov [#allocation2]  }
  0x10   :  { %232 = vmatpush.bf16.msra.mxu2 %v377_v22  ;;  %v382_v33 = vld [vmem:[%s523_s4] ss:$0 sm:$0xff]  ;;  %s268_s3 = sshll.u32 %s413_s2, 4  ;;  %s269_s3 = int_to_ptr.vmem [resolvable:$true] %s268_s3 }
  0x12   :  { %162 = vmatpush.bf16.msra.mxu0 %v363_v10 }
  0x13   :  { %175 = vmatpush.bf16.msra.mxu1 %v371_v11 }
  0x14   :  { %233 = vmatpush.bf16.msra.mxu2 %v376_v23 }
  0x16   :  { %163 = vmatpush.bf16.msra.mxu0 %v362_v12 }
  0x17   :  { %176 = vmatpush.bf16.msra.mxu1 %v370_v13 }
  0x1a   :  { %164 = vmatpush.bf16.msra.mxu0 %v361_v14 }
  0x1b   :  { %177 = vmatpush.bf16.msra.mxu1 %v369_v15 }
  0x1e   :  { %165 = vmatpush.bf16.msra.mxu0 %v360_v16 }
  0x1f   :  { %178 = vmatpush.bf16.msra.mxu1 %v368_v17 }
  0x21   :  { %166 = vmatmul.bf16.vlgmr.msra.gmra.mxu0 %v24_v20 }
  0x22   :  { %179 = vmatmul.bf16.vlgmr.msra.gmra.mxu1 %v25_v21 }
  0x9e   :  { %v167_v25 = vpop.f32.mrf.mxu0 }
  0x9f   :  { %v180_v26 = vpop.f32.mrf.mxu1  ;;  %v168_v27 = vadd.f32 %v381_v24, %v167_v25 }
  0xa1   :  { %v181_v28 = vadd.f32 %v180_v26, %v168_v27 }
  0xa3   :  { %v184_v29 = vmax.f32 %v181_v28, 0.0 }
  0xa5   :  { %v185_v30 = vpack.c.bf16 %v184_v29, %v184_v29 }
  0xa6   :  { %v169_v31 = vpop.f32.mrf.mxu0 }
  0xa7   :  { %v182_v32 = vpop.f32.mrf.mxu1  ;;  %359 = vmatmul.msk.bf16.vlgmr.msra.gmra.mxu2 %vm222_vm0, %v185_v30 }
 0x12a   :  { %v235_v34 = vpop.f32.mrf.mxu2 }
 0x12b   :  { %v236_v35 = vadd.f32 %v382_v33, %v235_v34 }
 0x12d   :  { %239 = vmax.xlane.f32.xlu0 %v236_v35 }
 0x132   :  { %v237_v36 = vpop.f32.mrf.mxu2 }
 0x1a0   :  { %v240_v37 = vpop.xlane.xlu0 %239 }
 0x1a1   :  { %v241_v38 = vsub.f32 %v236_v35, %v240_v37 }
 0x1a3   :  { %v242_v39 = vmul.f32 1.442695, %v241_v38 }
 0x1a5   :  { %383 = vpow2.f32 %v242_v39 }
 0x1ab   :  { %v384_v40 = vpop.eup %383 }
 0x1ac   :  { %244 = vadd.xlane.f32.xlu0 %v384_v40 }
 0x21f   :  { %v245_v41 = vpop.xlane.xlu0 %244 }
 0x220   :  { %385 = vrcp.f32 %v245_v41  ;;  %v257_v45 = vand.u32 2147483648, %v245_v41  ;;  %v255_v47 = vand.u32 2147483647, %v245_v41  ;;  %vm251_vm2 = vweird.f32 %v245_v41 }
 0x222   :  { %v258_v49 = vor.u32 1.1754944e-38, %v257_v45  ;;  %vm256_vm4 = vcmp.eq.f32.partialorder %v255_v47, 8.507059e+37 }
 0x226   :  { %v386_v42 = vpop.eup %385 }
 0x227   :  { %v247_v43 = vmul.f32 %v386_v42, %v245_v41  ;;  %vm252_vm1 = vweird.f32 %v386_v42 }
 0x228   :  { %vm253_vm3 = vmor %vm251_vm2, %vm252_vm1 }
 0x229   :  { %v248_v44 = vsub.f32 1.0, %v247_v43 }
 0x22b   :  { %v249_v46 = vmul.f32 %v386_v42, %v248_v44 }
 0x22d   :  { %v250_v48 = vadd.f32 %v386_v42, %v249_v46 }
 0x22f   :  { %v254_v50 = vsel %vm253_vm3, %v386_v42, %v250_v48 }
 0x230   :  { %v259_v51 = vsel %vm256_vm4, %v258_v49, %v254_v50 }
 0x231   :  { %v260_v52 = vmul.f32 %v384_v40, %v259_v51 }
 0x233   :  { %v261_v53 = vpack.c.bf16 %v260_v52, %v260_v52 }
 0x235   :  { %262 = vst [vmem:[#allocation2] sm:$0xf] %v261_v53 }
 0x236   :  { %273 = dma.vmem_to_hbm [thread:$0]  %s269_s3, 64, %s271_s15, [#allocation3]  }
 0x237   :  { %411 = dma.done.wait [#allocation3], 64  }
 0x238   :  { %412 = vsyncadd [#allocation3], 4294967232 }
 0x239   :  { %278 = vsyncpa [#allocation3], 1 }

</bundles_post_ra>
